<compile_context>
chip_gen: v7x
topology: tpu7x:2x2x1
jax: 0.10.0
libtpu: 0.0.40
codegen_flags: <defaults>
</compile_context>

<pallas_src>
import math

import jax
import jax.numpy as jnp
from jax import lax
from jax.experimental import pallas as pl
from jax.experimental.pallas import tpu as pltpu


def mlp_logsoftmax_kernel(x_ref, w1_ref, b1_ref, w2_ref, b2_ref, w3_ref, b3_ref,
                          o_ref):
    # x tile: (TILE_B, F), batch on sublanes as delivered from HBM.
    x = x_ref[...]

    # fc1 + bias + relu.  dot_general contracting the last dim of BOTH
    # operands (lhs (64, F), rhs (TILE_B, F)) -> (64, TILE_B): this is the
    # natively supported "rhs-transposed" MXU pattern, so no transpose of the
    # large x operand is ever materialized.  f32 accumulation on the MXU.
    h1 = lax.dot_general(
        w1_ref[...], x, (((1,), (1,)), ((), ())),
        preferred_element_type=jnp.float32) + b1_ref[...]
    h1 = jnp.maximum(h1, 0.0)
    # dropout(p=0.0) == identity

    # fc2 + bias + relu.  (32, 64) @ (64, TILE_B) -> (32, TILE_B).
    # Optionally bf16 matmul inputs (cast in-kernel, VPU-cheap), f32 accum.
    h2 = jnp.dot(w2_ref[...], h1.astype(w2_ref.dtype),
                 preferred_element_type=jnp.float32) + b2_ref[...]
    h2 = jnp.maximum(h2, 0.0)

    # fc3: (8, 32) @ (32, TILE_B) -> (8, TILE_B) logits, batch on lanes.
    logits = jnp.dot(w3_ref[...], h2.astype(w3_ref.dtype),
                     preferred_element_type=jnp.float32) + b3_ref[...]

    # Numerically stable log_softmax over the class axis (8 sublanes).
    # Sublane reductions run on the XLU, exp/log on the EUP; everything is
    # fully lane-dense, and the store of (8, TILE_B) is an unmasked vst.
    m = jnp.max(logits, axis=0, keepdims=True)
    lse = jnp.log(jnp.sum(jnp.exp(logits - m), axis=0, keepdims=True))
    o_ref[...] = (logits - m) - lse


def _round_up(x, m):
    return ((x + m - 1) // m) * m


def net_forward(x, params, *, tile_b=2048, matmul_dtype=jnp.float32):
    """Forward pass of Net.  params are in PyTorch layout: w (out, in), b (out,).

    matmul_dtype=jnp.bfloat16 uses bf16 MXU inputs for fc2/fc3 only (weights
    cast here — tiny; activations cast inside the kernel); fc1, accumulation
    and the whole epilogue stay f32.  Valid on v5e/v6e/v7x.
    """
    w1, b1, w2, b2, w3, b3 = params
    B, F = x.shape
    out_dim = w3.shape[0]
    assert tile_b % 128 == 0, "tile_b must be a multiple of 128 (lane width)"

    # Only the tiny resident weights/biases are touched in the wrapper; the
    # large streamed operand x goes to the kernel untouched (no pad/astype
    # HBM passes).
    w1c = w1.astype(jnp.float32)           # fc1 kept f32 (K=16; accuracy + no MXU win)
    w2c = w2.astype(matmul_dtype)
    w3c = w3.astype(matmul_dtype)
    b1c = b1.reshape(-1, 1).astype(jnp.float32)   # (out, 1): lane-broadcast in kernel
    b2c = b2.reshape(-1, 1).astype(jnp.float32)
    b3c = b3.reshape(-1, 1).astype(jnp.float32)

    # Batch tile selection:
    #   * small batch  -> single full-array tile (block dims == array dims),
    #   * medium batch -> split into >= 2 tiles (multiple of 128) so both v7x
    #     TensorCores get work on the "parallel" batch axis,
    #   * large batch  -> big fixed tiles (amortize per-step overhead); the
    #     ragged last block is handled by Pallas (masked writeback), no pad.
    if B < 256:
        tb = B
    elif B <= tile_b:
        tb = _round_up(pl.cdiv(B, 2), 128)
    else:
        tb = tile_b
    grid = (pl.cdiv(B, tb),)

    resident = lambda i: (0, 0)  # constant index map -> stays in VMEM, no re-DMA

    out_t = pl.pallas_call(
        mlp_logsoftmax_kernel,
        out_shape=jax.ShapeDtypeStruct((out_dim, B), jnp.float32),
        grid=grid,
        in_specs=[
            pl.BlockSpec((tb, F), lambda i: (i, 0)),   # streamed x tiles
            pl.BlockSpec(w1c.shape, resident),
            pl.BlockSpec(b1c.shape, resident),
            pl.BlockSpec(w2c.shape, resident),
            pl.BlockSpec(b2c.shape, resident),
            pl.BlockSpec(w3c.shape, resident),
            pl.BlockSpec(b3c.shape, resident),
        ],
        # Lane-dense output: (8, TILE_B) blocks along the batch/lane axis.
        out_specs=pl.BlockSpec((out_dim, tb), lambda i: (0, i)),
        compiler_params=pltpu.CompilerParams(
            # Independent batch tiles -> v7x shards them over both TCs;
            # harmless on single-TC v5e/v6e.
            dimension_semantics=("parallel",),
        ),
    )(x, w1c, b1c, w2c, b2c, w3c, b3c)

    # (8, B) -> (B, 8) to match the PyTorch module's output layout.  This is a
    # tiny (B*32-byte) transpose; skip it if a class-major consumer is fine.
    return out_t.T


def init_linear(key, fan_in, fan_out):
    # PyTorch nn.Linear default init: U(-1/sqrt(fan_in), 1/sqrt(fan_in)),
    # weight stored as (out_features, in_features), bias as (out_features,).
    kw, kb = jax.random.split(key)
    bound = 1.0 / math.sqrt(fan_in)
    w = jax.random.uniform(kw, (fan_out, fan_in), jnp.float32, -bound, bound)
    b = jax.random.uniform(kb, (fan_out,), jnp.float32, -bound, bound)
    return w, b


def reference_forward(x, params):
    w1, b1, w2, b2, w3, b3 = params
    h1 = jnp.maximum(x @ w1.T + b1, 0.0)
    h2 = jnp.maximum(h1 @ w2.T + b2, 0.0)
    logits = h2 @ w3.T + b3
    return jax.nn.log_softmax(logits, axis=-1)


if __name__ == "__main__":
    key = jax.random.PRNGKey(0)
    k_x, k1, k2, k3, k_big, k_rag = jax.random.split(key, 6)

    input_size = 16  # feature dim consistent with x.shape[1]
    w1, b1 = init_linear(k1, input_size, 64)
    w2, b2 = init_linear(k2, 64, 32)
    w3, b3 = init_linear(k3, 32, 8)
    params = (w1, b1, w2, b2, w3, b3)

    # --- small batch, f32 (single full-array tile) ---------------------------
    batch = 8
    # dataset preprocessing from the original script: x = x - 100
    x = jax.random.normal(k_x, (batch, input_size), jnp.float32) - 100.0
    out = jax.block_until_ready(net_forward(x, params))
    ref = reference_forward(x, params)
    assert out.shape == (batch, 8)
    assert jnp.allclose(out, ref, atol=1e-4, rtol=1e-4), "mismatch (f32 small)"

    # --- medium batch, f32: two tiles -> exercises the batch grid / megacore --
    big = 1024
    x_big = jax.random.normal(k_big, (big, input_size), jnp.float32) - 100.0
    out_big = jax.block_until_ready(net_forward(x_big, params))
    ref_big = reference_forward(x_big, params)
    assert out_big.shape == (big, 8)
    assert jnp.allclose(out_big, ref_big, atol=2e-4, rtol=2e-4), "mismatch (f32 medium)"

    # --- ragged large batch, f32: big tiles + partial last block (no jnp.pad) -
    rag = 4100
    x_rag = jax.random.normal(k_rag, (rag, input_size), jnp.float32) - 100.0
    out_rag = jax.block_until_ready(net_forward(x_rag, params))
    ref_rag = reference_forward(x_rag, params)
    assert out_rag.shape == (rag, 8)
    assert jnp.allclose(out_rag, ref_rag, atol=2e-4, rtol=2e-4), "mismatch (f32 ragged)"

    # --- bf16 MXU inputs for fc2/fc3 (fc1 + epilogue stay f32): sanity only ---
    out_bf16 = jax.block_until_ready(
        net_forward(x_big, params, matmul_dtype=jnp.bfloat16))
    assert out_bf16.shape == (big, 8)
    assert bool(jnp.all(jnp.isfinite(out_bf16))), "bf16 path produced non-finite values"

    print("KERNEL_OK")
</pallas_src>

<mosaic_0001>
module attributes {stable_mosaic.version = 11 : i64} {
  func.func @mlp_logsoftmax_kernel(%arg0: i32, %arg1: memref<8x16xf32, #tpu.memory_space<vmem>>, %arg2: memref<64x16xf32, #tpu.memory_space<vmem>>, %arg3: memref<64x1xf32, #tpu.memory_space<vmem>>, %arg4: memref<32x64xf32, #tpu.memory_space<vmem>>, %arg5: memref<32x1xf32, #tpu.memory_space<vmem>>, %arg6: memref<8x32xf32, #tpu.memory_space<vmem>>, %arg7: memref<8x1xf32, #tpu.memory_space<vmem>>, %arg8: memref<8x8xf32, #tpu.memory_space<vmem>>) attributes {dimension_semantics = [#tpu.dimension_semantics<parallel>], iteration_bounds = array<i64: 1>, scalar_prefetch = 0 : i64, scratch_operands = 0 : i64, tpu.core_type = #tpu.core_type<tc>, window_params = [{transform_indices = @transform_0, window_bounds = array<i64: 8, 16>}, {pipeline_mode = #tpu.pipeline_mode<synchronous>, transform_indices = @transform_1, window_bounds = array<i64: 64, 16>}, {pipeline_mode = #tpu.pipeline_mode<synchronous>, transform_indices = @transform_2, window_bounds = array<i64: 64, 1>}, {pipeline_mode = #tpu.pipeline_mode<synchronous>, transform_indices = @transform_3, window_bounds = array<i64: 32, 64>}, {pipeline_mode = #tpu.pipeline_mode<synchronous>, transform_indices = @transform_4, window_bounds = array<i64: 32, 1>}, {pipeline_mode = #tpu.pipeline_mode<synchronous>, transform_indices = @transform_5, window_bounds = array<i64: 8, 32>}, {pipeline_mode = #tpu.pipeline_mode<synchronous>, transform_indices = @transform_6, window_bounds = array<i64: 8, 1>}, {transform_indices = @transform_7, window_bounds = array<i64: 8, 8>}]} {
    %c0 = arith.constant 0 : index
    %c0_0 = arith.constant 0 : index
    %0 = vector.load %arg1[%c0, %c0_0] : memref<8x16xf32, #tpu.memory_space<vmem>>, vector<8x16xf32>
    %c0_1 = arith.constant 0 : index
    %c0_2 = arith.constant 0 : index
    %1 = vector.load %arg2[%c0_1, %c0_2] : memref<64x16xf32, #tpu.memory_space<vmem>>, vector<64x16xf32>
    %cst = arith.constant dense<0.000000e+00> : vector<64x8xf32>
    %2 = tpu.matmul %1, %0, %cst {dimension_numbers = #tpu.dot_dimension_numbers<[1], [1], [0], [0], [0, 0, 1, 0], [], []>} : vector<64x16xf32>, vector<8x16xf32>, vector<64x8xf32> -> vector<64x8xf32>
    %c0_3 = arith.constant 0 : index
    %c0_4 = arith.constant 0 : index
    %3 = vector.load %arg3[%c0_3, %c0_4] : memref<64x1xf32, #tpu.memory_space<vmem>>, vector<64x1xf32>
    %4 = vector.broadcast %3 : vector<64x1xf32> to vector<64x8xf32>
    %5 = arith.addf %2, %4 : vector<64x8xf32>
    %cst_5 = arith.constant 0.000000e+00 : f32
    %6 = vector.broadcast %cst_5 : f32 to vector<64x8xf32>
    %7 = arith.maximumf %5, %6 : vector<64x8xf32>
    %c0_6 = arith.constant 0 : index
    %c0_7 = arith.constant 0 : index
    %8 = vector.load %arg4[%c0_6, %c0_7] : memref<32x64xf32, #tpu.memory_space<vmem>>, vector<32x64xf32>
    %cst_8 = arith.constant dense<0.000000e+00> : vector<32x8xf32>
    %9 = tpu.matmul %8, %7, %cst_8 {dimension_numbers = #tpu.dot_dimension_numbers<[1], [0], [0], [1], [0, 0, 1, 1], [], []>} : vector<32x64xf32>, vector<64x8xf32>, vector<32x8xf32> -> vector<32x8xf32>
    %c0_9 = arith.constant 0 : index
    %c0_10 = arith.constant 0 : index
    %10 = vector.load %arg5[%c0_9, %c0_10] : memref<32x1xf32, #tpu.memory_space<vmem>>, vector<32x1xf32>
    %11 = vector.broadcast %10 : vector<32x1xf32> to vector<32x8xf32>
    %12 = arith.addf %9, %11 : vector<32x8xf32>
    %cst_11 = arith.constant 0.000000e+00 : f32
    %13 = vector.broadcast %cst_11 : f32 to vector<32x8xf32>
    %14 = arith.maximumf %12, %13 : vector<32x8xf32>
    %c0_12 = arith.constant 0 : index
    %c0_13 = arith.constant 0 : index
    %15 = vector.load %arg6[%c0_12, %c0_13] : memref<8x32xf32, #tpu.memory_space<vmem>>, vector<8x32xf32>
    %cst_14 = arith.constant dense<0.000000e+00> : vector<8x8xf32>
    %16 = tpu.matmul %15, %14, %cst_14 {dimension_numbers = #tpu.dot_dimension_numbers<[1], [0], [0], [1], [0, 0, 1, 1], [], []>} : vector<8x32xf32>, vector<32x8xf32>, vector<8x8xf32> -> vector<8x8xf32>
    %c0_15 = arith.constant 0 : index
    %c0_16 = arith.constant 0 : index
    %17 = vector.load %arg7[%c0_15, %c0_16] : memref<8x1xf32, #tpu.memory_space<vmem>>, vector<8x1xf32>
    %18 = vector.broadcast %17 : vector<8x1xf32> to vector<8x8xf32>
    %19 = arith.addf %16, %18 : vector<8x8xf32>
    %cst_17 = arith.constant dense<0xFF800000> : vector<8xf32>
    %20 = vector.multi_reduction <maximumf>, %19, %cst_17 [0] : vector<8x8xf32> to vector<8xf32>
    %21 = vector.shape_cast %20 : vector<8xf32> to vector<1x8xf32>
    %22 = vector.broadcast %21 : vector<1x8xf32> to vector<8x8xf32>
    %23 = arith.subf %19, %22 : vector<8x8xf32>
    %24 = math.exp %23 : vector<8x8xf32>
    %cst_18 = arith.constant dense<0.000000e+00> : vector<8xf32>
    %25 = vector.multi_reduction <add>, %24, %cst_18 [0] : vector<8x8xf32> to vector<8xf32>
    %26 = vector.shape_cast %25 : vector<8xf32> to vector<1x8xf32>
    %27 = math.log %26 : vector<1x8xf32>
    %28 = vector.broadcast %21 : vector<1x8xf32> to vector<8x8xf32>
    %29 = arith.subf %19, %28 : vector<8x8xf32>
    %30 = vector.broadcast %27 : vector<1x8xf32> to vector<8x8xf32>
    %31 = arith.subf %29, %30 : vector<8x8xf32>
    %c0_19 = arith.constant 0 : index
    %c0_20 = arith.constant 0 : index
    %32 = vector.load %arg8[%c0_19, %c0_20] : memref<8x8xf32, #tpu.memory_space<vmem>>, vector<8x8xf32>
    tpu.vector_store %arg8[%c0_19, %c0_20], %31 {strides = array<i32>} : memref<8x8xf32, #tpu.memory_space<vmem>>, vector<8x8xf32>,
    return
  }
  func.func @transform_0(%arg0: i32) -> (i32, i32) {
    %c0_i32 = arith.constant 0 : i32
    %c0_i32_0 = arith.constant 0 : i32
    return %arg0, %c0_i32 : i32, i32
  }
  func.func @transform_1(%arg0: i32) -> (i32, i32) {
    %c0_i32 = arith.constant 0 : i32
    %c0_i32_0 = arith.constant 0 : i32
    %c0_i32_1 = arith.constant 0 : i32
    return %c0_i32, %c0_i32_0 : i32, i32
  }
  func.func @transform_2(%arg0: i32) -> (i32, i32) {
    %c0_i32 = arith.constant 0 : i32
    %c0_i32_0 = arith.constant 0 : i32
    %c0_i32_1 = arith.constant 0 : i32
    return %c0_i32, %c0_i32_0 : i32, i32
  }
  func.func @transform_3(%arg0: i32) -> (i32, i32) {
    %c0_i32 = arith.constant 0 : i32
    %c0_i32_0 = arith.constant 0 : i32
    %c0_i32_1 = arith.constant 0 : i32
    return %c0_i32, %c0_i32_0 : i32, i32
  }
  func.func @transform_4(%arg0: i32) -> (i32, i32) {
    %c0_i32 = arith.constant 0 : i32
    %c0_i32_0 = arith.constant 0 : i32
    %c0_i32_1 = arith.constant 0 : i32
    return %c0_i32, %c0_i32_0 : i32, i32
  }
  func.func @transform_5(%arg0: i32) -> (i32, i32) {
    %c0_i32 = arith.constant 0 : i32
    %c0_i32_0 = arith.constant 0 : i32
    %c0_i32_1 = arith.constant 0 : i32
    return %c0_i32, %c0_i32_0 : i32, i32
  }
  func.func @transform_6(%arg0: i32) -> (i32, i32) {
    %c0_i32 = arith.constant 0 : i32
    %c0_i32_0 = arith.constant 0 : i32
    %c0_i32_1 = arith.constant 0 : i32
    return %c0_i32, %c0_i32_0 : i32, i32
  }
  func.func @transform_7(%arg0: i32) -> (i32, i32) {
    %c0_i32 = arith.constant 0 : i32
    %c0_i32_0 = arith.constant 0 : i32
    return %c0_i32, %arg0 : i32, i32
  }
}

</mosaic_0001>

<bundles_post_ra>
// kernel: tpu_custom_call.1
= control target key start
LH: loop header
LB: loop body
LE: loop exit
PB: predicated region body
PF: predicated region fallthrough
CT: control target
= control target key end

     0   :  { %vm84_vm0 = vcmask 130048   ;;  %v616_v3 = vmov 0   ;;  %s771_s0 = inlined_call_operand.vmem [shape: f32[8,16], index: 0, kind: input, shape index: {}]   ;;  %s772_s1 = inlined_call_operand.vmem [shape: f32[64,16], index: 1, kind: input, shape index: {}]   ;;  %s773_s2 = inlined_call_operand.vmem [shape: f32[64,1], index: 2, kind: input, shape index: {}]   ;;  %s774_s3 = inlined_call_operand.vmem [shape: f32[32,64], index: 3, kind: input, shape index: {}]   ;;  %s775_s4 = inlined_call_operand.vmem [shape: f32[32,1], index: 4, kind: input, shape index: {}]   ;;  %s776_s5 = inlined_call_operand.vmem [shape: f32[8,32], index: 5, kind: input, shape index: {}]   ;;  %s777_s6 = inlined_call_operand.vmem [shape: f32[8,1], index: 6, kind: input, shape index: {}]   ;;  %s778_s7 = inlined_call_operand.hbm [shape: f32[8,8], index: 7, kind: output, shape index: {}]  }
   0x1   :  { %v27_v0 = vld [vmem:[%s771_s0] sm:$0xff]  ;;  %v29_v2 = vld [vmem:[%s772_s1 + $0x8] sm:$0xff]  ;;  %586 = vset.pattern.permute.xlu0 %v616_v3  ;;  %v30_v4 = vld [vmem:[%s772_s1 + $0x10] sm:$0xff]  ;;  %587 = vset.pattern.permute.xlu1 %v616_v3 }
   0x2   :  { %v28_v1 = vld [vmem:[%s772_s1] sm:$0xff]  ;;  %512 = vmatprep.subr.msk.mxu0 %vm84_vm0, %v27_v0  ;;  %v38_v6 = vld [vmem:[%s773_s2 + $0x10] sm:$0xff]  ;;  %v37_v7 = vld [vmem:[%s773_s2 + $0x8] sm:$0xff] }
   0x3   :  { %514 = vmatprep.mubr.msk.f32.mxu0 %vm84_vm0, %v28_v1  ;;  %513 = vmatpush3.xpose.msk.msra.mxu0 %vm84_vm0, %v27_v0  ;;  %v36_v5 = vld [vmem:[%s773_s2] sm:$0xff]  ;;  %v39_v8 = vld [vmem:[%s773_s2 + $0x18] sm:$0xff] }
   0x4   :  { %46 = vperm.xlu0 %586, %v36_v5   ;;  %56 = vperm.xlu1 %587, %v38_v6   ;;  %v31_v9 = vld [vmem:[%s772_s1 + $0x18] sm:$0xff]  ;;  %v32_v10 = vld [vmem:[%s772_s1 + $0x20] sm:$0xff] }
   0x6   :  { %515 = vmatmul.mubr.msk.f32.vlgmr.msra.gmra.mrb[0].mxu0 %vm84_vm0, %v29_v2 }
   0x7   :  { %517 = vmatprep.mubr.msk.f32.mxu0 %vm84_vm0, %v30_v4 }
   0x8   :  { %12 = vsyncpa [#allocation3], 0  ;;  %51 = vperm.xlu0 %586, %v37_v7   ;;  %61 = vperm.xlu1 %587, %v39_v8   ;;  %v40_v11 = vld [vmem:[%s773_s2 + $0x20] sm:$0xff]  ;;  %v41_v12 = vld [vmem:[%s773_s2 + $0x28] sm:$0xff]  ;;  %vm253_vm1 = vcmask 523264   ;;  %v617_v63 = vmov 0.0|0.0  }
   0x9   :  { %v33_v13 = vld [vmem:[%s772_s1 + $0x28] sm:$0xff]  ;;  %v34_v14 = vld [vmem:[%s772_s1 + $0x30] sm:$0xff]  ;;  %v43_v16 = vld [vmem:[%s773_s2 + $0x38] sm:$0xff]  ;;  %575 = vmatprep.subr.bf16.mxu0 %v617_v63  ;;  %vm618_vm2 = vmmov 0   ;;  %v619_v0 = vmov 0.0   ;;  %vm362_vm3 = vcmask 261120  }
   0xa   :  { %518 = vmatmul.mubr.msk.f32.gmra.mrb[2].mxu0 %vm84_vm0, %v31_v9  ;;  %v42_v15 = vld [vmem:[%s773_s2 + $0x30] sm:$0xff]  ;;  %v35_v17 = vld [vmem:[%s772_s1 + $0x38] sm:$0xff]  ;;  %v229_v18 = vld [vmem:[%s775_s4] sm:$0xff]  ;;  %vm436_vm4 = vcmask 64512  }
   0xb   :  { %520 = vmatprep.mubr.msk.f32.mxu0 %vm84_vm0, %v32_v10  ;;  %v230_v19 = vld [vmem:[%s775_s4 + $0x8] sm:$0xff]  ;;  %v231_v20 = vld [vmem:[%s775_s4 + $0x10] sm:$0xff]  ;;  %v232_v21 = vld [vmem:[%s775_s4 + $0x18] sm:$0xff] }
   0xc   :  { %66 = vperm.xlu0 %586, %v40_v11   ;;  %71 = vperm.xlu1 %587, %v41_v12   ;;  %v356_v22 = vld [vmem:[%s777_s6] sm:$0xff]  ;;  %v226_v60 = vld [vmem:[%s774_s3 + $0x8] sm:$0xff]  ;;  %v227_v61 = vld [vmem:[%s774_s3 + $0x10] sm:$0xff] }
   0xd   :  { %v225_v23 = vld [vmem:[%s774_s3] sm:$0xff]  ;;  %v228_v62 = vld [vmem:[%s774_s3 + $0x18] sm:$0xff] }
   0xe   :  { %521 = vmatmul.mubr.msk.f32.gmra.mrb[4].mxu0 %vm84_vm0, %v33_v13  ;;  %542 = vmatprep.mubr.msk.f32.mxu1 %vm253_vm1, %v225_v23 }
   0xf   :  { %523 = vmatprep.mubr.msk.f32.mxu0 %vm84_vm0, %v34_v14 }
  0x10   :  { %76 = vperm.xlu0 %586, %v42_v15   ;;  %81 = vperm.xlu1 %587, %v43_v16  }
  0x12   :  { %524 = vmatmul.mubr.msk.f32.gmra.mrb[6].mxu0 %vm84_vm0, %v35_v17 }
  0x13   :  { %556 = vmatprep.mubr.msk.f32.mxu0 %vm618_vm2, %v619_v0 }
  0x14   :  { %235 = vperm.xlu0 %586, %v229_v18   ;;  %240 = vperm.xlu1 %587, %v230_v19   ;;  %v355_v19 = vld [vmem:[%s776_s5] sm:$0xff]  ;;  %s620_s5 = smov [#allocation2]  }
  0x15   :  { %s464_s25 = sshll.u32 %s620_s5, 4  ;;  %s465_s25 = int_to_ptr.vmem [resolvable:$true] %s464_s25 }
  0x16   :  { %s592_s26 = scalar_lea.vmem %s465_s25, 128  ;;  %p597_p1 = scmp.lt.s32.totalorder %s465_s25, %s465_s25 }
  0x17   :  { %p593_p0 = scmp.ne.s32.totalorder %s465_s25, %s592_s26  ;;  %p598_p2 = scmp.lt.s32.totalorder %s592_s26, %s592_s26 }
  0x18   :  { %245 = vperm.xlu0 %586, %v231_v20   ;;  %250 = vperm.xlu1 %587, %v232_v21  }
  0x19   :  { %p599_p3 = por %p598_p2, %p597_p1 }
  0x1b   :  { %p600_p4 = pnand %p599_p3, %p593_p0 }
  0x1c   :  { %359 = vperm.xlu0 %586, %v356_v22  }
  0x83   :  { %v47_v24 = vpop.permute.xlu0 %46  ;;  %v57_v25 = vpop.permute.xlu1 %56 }
  0x87   :  { %v52_v26 = vpop.permute.xlu0 %51  ;;  %v62_v27 = vpop.permute.xlu1 %61 }
  0x8b   :  { %v72_v37 = vpop.permute.xlu1 %71  ;;  %v67_v40 = vpop.permute.xlu0 %66 }
  0x8f   :  { %v82_v49 = vpop.permute.xlu1 %81  ;;  %v77_v52 = vpop.permute.xlu0 %76 }
  0x93   :  { %v241_v1 = vpop.permute.xlu1 %240  ;;  %v236_v2 = vpop.permute.xlu0 %235 }
  0x97   :  { %v251_v8 = vpop.permute.xlu1 %250  ;;  %v246_v11 = vpop.permute.xlu0 %245 }
  0x9b   :  { %v360_v20 = vpop.permute.xlu0 %359 }
  0xd9   :  { %v516_v28 = vpop.f32.mrb[0].mxu0 }
  0xda   :  { %v184_v29 = vadd.f32 %v516_v28, %v52_v26  ;;  %v178_v30 = vpop.f32.mrb[1].mxu0 }
  0xdb   :  { %v179_v31 = vadd.f32 %v178_v30, %v47_v24 }
  0xdc   :  { %v218_v32 = vmax.f32 %v184_v29, 0.0 }
  0xdd   :  { %v217_v33 = vmax.f32 %v179_v31, 0.0  ;;  %v519_v34 = vpop.f32.mrb[2].mxu0 }
  0xde   :  { %v194_v35 = vadd.f32 %v519_v34, %v62_v27  ;;  %v188_v36 = vpop.f32.mrb[3].mxu0 }
  0xdf   :  { %v189_v38 = vadd.f32 %v188_v36, %v57_v25  ;;  %v559_v39 = vpack.c.bf16 %v218_v32, %v217_v33 }
  0xe0   :  { %v220_v41 = vmax.f32 %v194_v35, 0.0 }
  0xe1   :  { %v219_v42 = vmax.f32 %v189_v38, 0.0  ;;  %v522_v43 = vpop.f32.mrb[4].mxu0  ;;  %560 = vmatprep.subr.bf16.mxu1 %v559_v39 }
  0xe2   :  { %v204_v44 = vadd.f32 %v522_v43, %v72_v37  ;;  %v198_v45 = vpop.f32.mrb[5].mxu0  ;;  %562 = vmatpush3.bf16.msra.mxu1 %v559_v39 }
  0xe3   :  { %v563_v46 = vpack.c.bf16 %v220_v41, %v219_v42  ;;  %v199_v47 = vadd.f32 %v198_v45, %v67_v40 }
  0xe4   :  { %v222_v48 = vmax.f32 %v204_v44, 0.0 }
  0xe5   :  { %v221_v50 = vmax.f32 %v199_v47, 0.0  ;;  %v525_v51 = vpop.f32.mrb[6].mxu0  ;;  %564 = vmatprep.subr.bf16.mxu1 %v563_v46 }
  0xe6   :  { %v214_v53 = vadd.f32 %v525_v51, %v82_v49  ;;  %v208_v54 = vpop.f32.mrb[7].mxu0  ;;  %566 = vmatpush3.bf16.msra.mxu1 %v563_v46 }
  0xe7   :  { %v567_v55 = vpack.c.bf16 %v222_v48, %v221_v50  ;;  %v209_v56 = vadd.f32 %v208_v54, %v77_v52 }
  0xe8   :  { %v224_v57 = vmax.f32 %v214_v53, 0.0 }
  0xe9   :  { %v223_v58 = vmax.f32 %v209_v56, 0.0  ;;  %568 = vmatprep.subr.bf16.mxu1 %v567_v55 }
  0xea   :  { %570 = vmatpush3.bf16.msra.mxu1 %v567_v55 }
  0xeb   :  { %v571_v59 = vpack.c.bf16 %v224_v57, %v223_v58 }
  0xed   :  { %572 = vmatprep.subr.bf16.mxu1 %v571_v59 }
  0xee   :  { %574 = vmatpush3.bf16.msra.mxu1 %v571_v59 }
  0xf1   :  { %543 = vmatmul.mubr.msk.f32.vlgmr.msra.gmra.mrb[0].mxu1 %vm253_vm1, %v226_v60 }
  0xf2   :  { %545 = vmatprep.mubr.msk.f32.mxu1 %vm253_vm1, %v227_v61 }
  0xf5   :  { %546 = vmatmul.mubr.msk.f32.gmra.mrb[2].mxu1 %vm253_vm1, %v228_v62 }
 0x1c4   :  { %v544_v3 = vpop.f32.mrb[0].mxu1 }
 0x1c5   :  { %v338_v4 = vadd.f32 %v544_v3, %v241_v1  ;;  %v332_v5 = vpop.f32.mrb[1].mxu1 }
 0x1c6   :  { %v333_v6 = vadd.f32 %v332_v5, %v236_v2 }
 0x1c7   :  { %v352_v7 = vmax.f32 %v338_v4, 0.0 }
 0x1c8   :  { %v351_v9 = vmax.f32 %v333_v6, 0.0  ;;  %v547_v10 = vpop.f32.mrb[2].mxu1 }
 0x1c9   :  { %v348_v12 = vadd.f32 %v547_v10, %v251_v8  ;;  %v342_v13 = vpop.f32.mrb[3].mxu1 }
 0x1ca   :  { %v576_v14 = vpack.c.bf16 %v352_v7, %v351_v9  ;;  %v343_v15 = vadd.f32 %v342_v13, %v246_v11 }
 0x1cb   :  { %v354_v16 = vmax.f32 %v348_v12, 0.0 }
 0x1cc   :  { %v353_v17 = vmax.f32 %v343_v15, 0.0  ;;  %577 = vmatpush3.bf16.msra.mxu0 %v576_v14 }
 0x1cd   :  { %578 = vmatprep.subr.bf16.mxu0 %v617_v63 }
 0x1ce   :  { %v579_v18 = vpack.c.bf16 %v354_v16, %v353_v17 }
 0x1d0   :  { %580 = vmatpush3.bf16.msra.mxu0 %v579_v18 }
 0x1d3   :  { %557 = vmatmul.mubr.msk.f32.vlgmr.msra.gmra.mrb[8].mxu0 %vm362_vm3, %v355_v19 }
 0x2a6   :  { %v432_v21 = vpop.f32.mrb[8].mxu0 }
 0x2a7   :  { %v433_v22 = vadd.f32 %v432_v21, %v360_v20  ;;  %v558_v23 = vpop.f32.mrb[9].mxu0 }
 0x2a9   :  { %v437_v24 = vsel %vm436_vm4, %v433_v22, -inf }
 0x2aa   :  { %v438_v25 = vrot.slane %v437_v24, 4 }
 0x2ac   :  { %v439_v26 = vmax.f32 %v437_v24, %v438_v25 }
 0x2ae   :  { %v440_v27 = vrot.slane %v439_v26, 2 }
 0x2b0   :  { %v441_v28 = vmax.f32 %v439_v26, %v440_v27 }
 0x2b2   :  { %v442_v29 = vrot.slane %v441_v28, 1 }
 0x2b4   :  { %v443_v30 = vmax.f32 %v441_v28, %v442_v29 }
 0x2b6   :  { %v444_v31 = vsub.f32 %v433_v22, %v443_v30 }
 0x2b8   :  { %v445_v32 = vmul.f32 1.442695, %v444_v31 }
 0x2ba   :  { %588 = vpow2.f32 %v445_v32 }
 0x2c4   :  { %v589_v33 = vpop.eup %588 }
 0x2c5   :  { %v447_v34 = vsel %vm436_vm4, %v589_v33, 0.0 }
 0x2c6   :  { %v448_v35 = vrot.slane %v447_v34, 4 }
 0x2c8   :  { %v449_v36 = vadd.f32 %v448_v35, %v447_v34 }
 0x2ca   :  { %v450_v37 = vrot.slane %v449_v36, 2 }
 0x2cc   :  { %v451_v38 = vadd.f32 %v450_v37, %v449_v36 }
 0x2ce   :  { %v452_v39 = vrot.slane %v451_v38, 1 }
 0x2d0   :  { %v453_v40 = vadd.f32 %v452_v39, %v451_v38 }
 0x2d2   :  { %590 = vlog2.f32 %v453_v40 }
 0x2dc   :  { %v591_v41 = vpop.eup %590 }
 0x2dd   :  { %v455_v42 = vmul.f32 0.6931472, %v591_v41 }
 0x2df   :  { %v456_v43 = vsub.f32 %v444_v31, %v455_v42 }
 0x2e1   :  { %457 = vst.msk [vmem:[#allocation2] sm:$0xff] %vm436_vm4, %v456_v43 }
 0x2e2   :  { %603 = shalt.err (!%p600_p4)
}
 0x2e3   :  { %s604_s29 = scalar_lea.hbm %s778_s7, 128 }
 0x2e4   :  { %p605_p5 = scmp.ne.s32.totalorder %s778_s7, %s604_s29  ;;  %p608_p6 = scmp.lt.u32.totalorder %s604_s29, %s778_s7 }
 0x2e6   :  { %p610_p7 = pnand %p608_p6, %p605_p5 }
 0x2e8   :  { %613 = shalt.err (!%p610_p7)
}
 0x2e9   :  { %467 = dma.vmem_to_hbm [thread:$0]  %s465_s25, 128, %s778_s7, [#allocation3]  }
 0x2ea   :  { %614 = dma.done.wait [#allocation3], 128  }
 0x2eb   :  { %615 = vsyncadd [#allocation3], 4294967168 }
 0x2ec   :  { %471 = vsyncpa [#allocation3], 1 }

</bundles_post_ra>
